<compile_context>
chip_gen: v6e
topology: v6e:2x2x1
jax: 0.10.0
libtpu: 0.0.40
codegen_flags: <defaults>
</compile_context>

<pallas_src>
import math

import jax
import jax.numpy as jnp
from jax.experimental import pallas as pl
from jax.experimental.pallas import tpu as pltpu


def _round_up(n: int, m: int) -> int:
    return ((n + m - 1) // m) * m


def hgnn_conv_kernel(g_ref, x_ref, w_ref, b_ref, o_ref, acc_ref):
    # Grid: (i = output row tile of G, k = reduction tile over N).
    k = pl.program_id(1)

    @pl.when(k == 0)
    def _():
        acc_ref[...] = jnp.zeros_like(acc_ref)

    # x[k_tile] @ W + bias  (W, bias are VMEM-resident; bias added once per
    # k-tile row, which distributes correctly through G @ (XW + 1 b^T)).
    xw = jnp.dot(x_ref[...], w_ref[...], preferred_element_type=jnp.float32)
    xw = xw + b_ref[...].astype(jnp.float32)

    # Deliberately match the input precision for the second matmul operand
    # (identity for f32 inputs; rounds the intermediate if inputs are bf16).
    xw = xw.astype(g_ref.dtype)

    # Accumulate the G row-tile x reduction-tile contribution in f32.
    acc_ref[...] += jnp.dot(g_ref[...], xw,
                            preferred_element_type=jnp.float32)

    @pl.when(k == pl.num_programs(1) - 1)
    def _():
        o_ref[...] = acc_ref[...].astype(o_ref.dtype)


def hgnn_conv(x, weight, bias, G, *, tm: int = 256, tk: int = 512):
    """Pallas implementation of HGNN_conv.forward(x, G).

    x:      [N, H]
    weight: [H, H]
    bias:   [H] or None
    G:      [N, N]
    """
    N, H = x.shape
    assert weight.shape == (H, H)
    assert G.shape == (N, N)
    if bias is None:
        bias = jnp.zeros((H,), dtype=x.dtype)

    # --- Lane-dense hidden dim: pad H up to a multiple of 128. -------------
    Hp = _round_up(max(H, 128), 128)

    # --- Tile sizes: multiples of 128, clamped for small N; pad N so both
    #     the row-tile (tm) and reduction-tile (tk) divide it evenly. --------
    n128 = _round_up(N, 128)
    tm = min(tm, n128)
    tk = min(tk, n128)
    Np = _round_up(N, math.lcm(tm, tk))

    dt = x.dtype
    x_p = jnp.zeros((Np, Hp), dtype=dt).at[:N, :H].set(x)
    w_p = jnp.zeros((Hp, Hp), dtype=dt).at[:H, :H].set(weight.astype(dt))
    b_p = jnp.zeros((1, Hp), dtype=dt).at[0, :H].set(bias.astype(dt))
    g_p = jnp.zeros((Np, Np), dtype=dt).at[:N, :N].set(G.astype(dt))

    grid = (Np // tm, Np // tk)

    itemsize = jnp.dtype(dt).itemsize
    cost = pl.CostEstimate(
        flops=2 * N * N * H + 2 * N * H * H,
        transcendentals=0,
        bytes_accessed=itemsize * (N * N + 2 * N * H + H * H + H),
    )

    out_p = pl.pallas_call(
        hgnn_conv_kernel,
        out_shape=jax.ShapeDtypeStruct((Np, Hp), dt),
        grid_spec=pltpu.PrefetchScalarGridSpec(
            num_scalar_prefetch=0,
            grid=grid,
            in_specs=[
                # G row-tile x reduction-tile: the streamed, bandwidth-bound input.
                pl.BlockSpec((tm, tk), lambda i, k: (i, k)),
                # x reduction-tile (full lane-padded hidden dim).
                pl.BlockSpec((tk, Hp), lambda i, k: (k, 0)),
                # W and bias: tiny, VMEM-resident across the whole grid.
                pl.BlockSpec((Hp, Hp), lambda i, k: (0, 0)),
                pl.BlockSpec((1, Hp), lambda i, k: (0, 0)),
            ],
            out_specs=pl.BlockSpec((tm, Hp), lambda i, k: (i, 0)),
            scratch_shapes=[pltpu.VMEM((tm, Hp), jnp.float32)],
        ),
        compiler_params=pltpu.CompilerParams(
            dimension_semantics=("parallel", "arbitrary"),
        ),
        cost_estimate=cost,
    )(g_p, x_p, w_p, b_p)

    return out_p[:N, :H]


if __name__ == "__main__":
    key = jax.random.PRNGKey(0)
    k_x, k_g, k_w, k_b = jax.random.split(key, 4)

    N, n_hid = 16, 32  # small shapes: 16 nodes, hidden size 32

    # Module parameters (matching nn.init.normal_(std=0.02))
    weight = 0.02 * jax.random.normal(k_w, (n_hid, n_hid), dtype=jnp.float32)
    bias = 0.02 * jax.random.normal(k_b, (n_hid,), dtype=jnp.float32)

    # Example inputs
    x = jax.random.normal(k_x, (N, n_hid), dtype=jnp.float32)
    G = jax.random.normal(k_g, (N, N), dtype=jnp.float32)

    out = hgnn_conv(x, weight, bias, G)
    out = jax.block_until_ready(out)

    # Reference check in plain JAX (same math as the PyTorch module)
    ref = G @ (x @ weight + bias)
    assert out.shape == (N, n_hid)
    assert jnp.allclose(out, ref, atol=1e-4, rtol=1e-4), (
        float(jnp.max(jnp.abs(out - ref))))

    print("KERNEL_OK")
</pallas_src>

<mosaic_0001>
module attributes {stable_mosaic.version = 11 : i64} {
  func.func @hgnn_conv_kernel(%arg0: i32, %arg1: i32, %arg2: memref<128x128xf32, #tpu.memory_space<vmem>>, %arg3: memref<128x128xf32, #tpu.memory_space<vmem>>, %arg4: memref<128x128xf32, #tpu.memory_space<vmem>>, %arg5: memref<1x128xf32, #tpu.memory_space<vmem>>, %arg6: memref<128x128xf32, #tpu.memory_space<vmem>>, %arg7: memref<128x128xf32, #tpu.memory_space<vmem>>) attributes {dimension_semantics = [#tpu.dimension_semantics<parallel>, #tpu.dimension_semantics<arbitrary>], iteration_bounds = array<i64: 1, 1>, scalar_prefetch = 0 : i64, scratch_operands = 1 : i64, tpu.core_type = #tpu.core_type<tc>, window_params = [{transform_indices = @transform_0, window_bounds = array<i64: 128, 128>}, {transform_indices = @transform_1, window_bounds = array<i64: 128, 128>}, {pipeline_mode = #tpu.pipeline_mode<synchronous>, transform_indices = @transform_2, window_bounds = array<i64: 128, 128>}, {pipeline_mode = #tpu.pipeline_mode<synchronous>, transform_indices = @transform_3, window_bounds = array<i64: 1, 128>}, {transform_indices = @transform_4, window_bounds = array<i64: 128, 128>}]} {
    %c0_i32 = arith.constant 0 : i32
    %0 = arith.cmpi eq, %arg1, %c0_i32 : i32
    %1 = arith.extui %0 : i1 to i32
    %c0_i32_0 = arith.constant 0 : i32
    %2 = arith.cmpi ne, %1, %c0_i32_0 : i32
    scf.if %2 {
      %cst_15 = arith.constant 0.000000e+00 : f32
      %17 = vector.broadcast %cst_15 : f32 to vector<128x128xf32>
      %c0_16 = arith.constant 0 : index
      %c0_17 = arith.constant 0 : index
      %18 = vector.load %arg7[%c0_16, %c0_17] : memref<128x128xf32, #tpu.memory_space<vmem>>, vector<128x128xf32>
      tpu.vector_store %arg7[%c0_16, %c0_17], %17 {strides = array<i32>} : memref<128x128xf32, #tpu.memory_space<vmem>>, vector<128x128xf32>,
    } else {
    }
    %c0 = arith.constant 0 : index
    %c0_1 = arith.constant 0 : index
    %3 = vector.load %arg3[%c0, %c0_1] : memref<128x128xf32, #tpu.memory_space<vmem>>, vector<128x128xf32>
    %c0_2 = arith.constant 0 : index
    %c0_3 = arith.constant 0 : index
    %4 = vector.load %arg4[%c0_2, %c0_3] : memref<128x128xf32, #tpu.memory_space<vmem>>, vector<128x128xf32>
    %cst = arith.constant dense<0.000000e+00> : vector<128x128xf32>
    %5 = tpu.matmul %3, %4, %cst {dimension_numbers = #tpu.dot_dimension_numbers<[1], [0], [0], [1], [0, 0, 1, 1], [], []>} : vector<128x128xf32>, vector<128x128xf32>, vector<128x128xf32> -> vector<128x128xf32>
    %c0_4 = arith.constant 0 : index
    %c0_5 = arith.constant 0 : index
    %6 = vector.load %arg5[%c0_4, %c0_5] : memref<1x128xf32, #tpu.memory_space<vmem>>, vector<1x128xf32>
    %7 = vector.broadcast %6 : vector<1x128xf32> to vector<128x128xf32>
    %8 = arith.addf %5, %7 : vector<128x128xf32>
    %c0_6 = arith.constant 0 : index
    %c0_7 = arith.constant 0 : index
    %9 = vector.load %arg7[%c0_6, %c0_7] : memref<128x128xf32, #tpu.memory_space<vmem>>, vector<128x128xf32>
    %c0_8 = arith.constant 0 : index
    %c0_9 = arith.constant 0 : index
    %10 = vector.load %arg2[%c0_8, %c0_9] : memref<128x128xf32, #tpu.memory_space<vmem>>, vector<128x128xf32>
    %cst_10 = arith.constant dense<0.000000e+00> : vector<128x128xf32>
    %11 = tpu.matmul %10, %8, %cst_10 {dimension_numbers = #tpu.dot_dimension_numbers<[1], [0], [0], [1], [0, 0, 1, 1], [], []>} : vector<128x128xf32>, vector<128x128xf32>, vector<128x128xf32> -> vector<128x128xf32>
    %12 = arith.addf %9, %11 : vector<128x128xf32>
    %c0_11 = arith.constant 0 : index
    %c0_12 = arith.constant 0 : index
    %13 = vector.load %arg7[%c0_11, %c0_12] : memref<128x128xf32, #tpu.memory_space<vmem>>, vector<128x128xf32>
    tpu.vector_store %arg7[%c0_11, %c0_12], %12 {strides = array<i32>} : memref<128x128xf32, #tpu.memory_space<vmem>>, vector<128x128xf32>,
    %c0_i32_13 = arith.constant 0 : i32
    %14 = arith.cmpi eq, %arg1, %c0_i32_13 : i32
    %15 = arith.extui %14 : i1 to i32
    %c0_i32_14 = arith.constant 0 : i32
    %16 = arith.cmpi ne, %15, %c0_i32_14 : i32
    scf.if %16 {
      %c0_15 = arith.constant 0 : index
      %c0_16 = arith.constant 0 : index
      %17 = vector.load %arg7[%c0_15, %c0_16] : memref<128x128xf32, #tpu.memory_space<vmem>>, vector<128x128xf32>
      %c0_17 = arith.constant 0 : index
      %c0_18 = arith.constant 0 : index
      %18 = vector.load %arg6[%c0_17, %c0_18] : memref<128x128xf32, #tpu.memory_space<vmem>>, vector<128x128xf32>
      tpu.vector_store %arg6[%c0_17, %c0_18], %17 {strides = array<i32>} : memref<128x128xf32, #tpu.memory_space<vmem>>, vector<128x128xf32>,
    } else {
    }
    return
  }
  func.func @transform_0(%arg0: i32, %arg1: i32) -> (i32, i32) {
    %c0_i32 = arith.constant 0 : i32
    return %arg0, %arg1 : i32, i32
  }
  func.func @transform_1(%arg0: i32, %arg1: i32) -> (i32, i32) {
    %c0_i32 = arith.constant 0 : i32
    %c0_i32_0 = arith.constant 0 : i32
    return %arg1, %c0_i32 : i32, i32
  }
  func.func @transform_2(%arg0: i32, %arg1: i32) -> (i32, i32) {
    %c0_i32 = arith.constant 0 : i32
    %c0_i32_0 = arith.constant 0 : i32
    %c0_i32_1 = arith.constant 0 : i32
    return %c0_i32, %c0_i32_0 : i32, i32
  }
  func.func @transform_3(%arg0: i32, %arg1: i32) -> (i32, i32) {
    %c0_i32 = arith.constant 0 : i32
    %c0_i32_0 = arith.constant 0 : i32
    %c0_i32_1 = arith.constant 0 : i32
    return %c0_i32, %c0_i32_0 : i32, i32
  }
  func.func @transform_4(%arg0: i32, %arg1: i32) -> (i32, i32) {
    %c0_i32 = arith.constant 0 : i32
    %c0_i32_0 = arith.constant 0 : i32
    return %arg0, %c0_i32 : i32, i32
  }
}

</mosaic_0001>

<bundles_post_ra>
// kernel: tpu_custom_call.1
= control target key start
LH: loop header
LB: loop body
LE: loop exit
PB: predicated region body
PF: predicated region fallthrough
CT: control target
= control target key end

     0   :  { %9 = vsyncpa [#allocation4], 0  ;;  %s852_s0 = inlined_call_operand.hbm [shape: f32[128,128], index: 0, kind: input, shape index: {}]   ;;  %s853_s1 = inlined_call_operand.hbm [shape: f32[128,128], index: 1, kind: input, shape index: {}]   ;;  %s854_s2 = inlined_call_operand.hbm [shape: f32[128,128], index: 2, kind: input, shape index: {}]   ;;  %s855_s3 = inlined_call_operand.vmem [shape: f32[1,128], index: 3, kind: input, shape index: {}]   ;;  %s856_s4 = inlined_call_operand.hbm [shape: f32[128,128], index: 4, kind: output, shape index: {}]  }
   0x1   :  { %10 = vsyncpa [#allocation7], 0 }
   0x2   :  { %11 = vsyncpa [#allocation5], 0  ;;  %s794_s15 = smov [#allocation6]   ;;  %s795_s17 = smov [#allocation3]  }
   0x3   :  { %s29_s16 = sshll.u32 %s794_s15, 4  ;;  %s17_s18 = sshll.u32 %s795_s17, 4  ;;  %s30_s16 = int_to_ptr.vmem [resolvable:$true] %s29_s16  ;;  %s18_s18 = int_to_ptr.vmem [resolvable:$true] %s17_s18 }
   0x4   :  { %s716_s19 = scalar_lea.vmem %s30_s16, 2048  ;;  %p721_p1 = scmp.lt.s32.totalorder %s30_s16, %s30_s16 }
   0x5   :  { %p717_p0 = scmp.ne.s32.totalorder %s30_s16, %s716_s19  ;;  %p722_p2 = scmp.lt.s32.totalorder %s716_s19, %s716_s19 }
   0x7   :  { %p723_p3 = por %p722_p2, %p721_p1 }
   0x9   :  { %p724_p4 = pnand %p723_p3, %p717_p0 }
   0xb   :  { %727 = shalt.err (!%p724_p4)
}
   0xc   :  { %s796_s20 = smov 128   ;;  %s797_s21 = smov 8  }
   0xd   :  { %35 = dma.hbm_to_vmem [thread:$0]  %s853_s1, 2048, %s30_s16, [#allocation7], %s796_s20, %s796_s20, %s797_s21  }
   0xe   :  { %s736_s24 = scalar_lea.vmem %s18_s18, 2048  ;;  %p741_p6 = scmp.lt.s32.totalorder %s18_s18, %s18_s18 }
   0xf   :  { %p737_p5 = scmp.ne.s32.totalorder %s18_s18, %s736_s24  ;;  %p742_p7 = scmp.lt.s32.totalorder %s736_s24, %s736_s24 }
  0x11   :  { %p743_p8 = por %p742_p7, %p741_p6 }
  0x13   :  { %p744_p9 = pnand %p743_p8, %p737_p5 }
  0x15   :  { %747 = shalt.err (!%p744_p9)
}
  0x16   :  { %23 = dma.hbm_to_vmem [thread:$0]  %s852_s0, 2048, %s18_s18, [#allocation4], %s796_s20, %s796_s20, %s797_s21  }
  0x17   :  { %s798_s27 = smov [#allocation8]  }
  0x18   :  { %s41_s28 = sshll.u32 %s798_s27, 4  ;;  %s42_s28 = int_to_ptr.vmem [resolvable:$true] %s41_s28 }
  0x19   :  { %s756_s29 = scalar_lea.vmem %s42_s28, 2048  ;;  %p761_p11 = scmp.lt.s32.totalorder %s42_s28, %s42_s28 }
  0x1a   :  { %p757_p10 = scmp.ne.s32.totalorder %s42_s28, %s756_s29  ;;  %p762_p12 = scmp.lt.s32.totalorder %s756_s29, %s756_s29 }
  0x1c   :  { %p763_p13 = por %p762_p12, %p761_p11 }
  0x1e   :  { %p764_p0 = pnand %p763_p13, %p757_p10 }
  0x20   :  { %767 = shalt.err (!%p764_p0)
}
  0x21   :  { %47 = dma.hbm_to_vmem [thread:$0]  %s854_s2, 2048, %s42_s28, [#allocation7], %s796_s20, %s796_s20, %s797_s21  }
  0x22   :  { %788 = dma.done.wait [#allocation4], 2048  }
  0x23   :  { %789 = vsyncadd [#allocation4], 4294965248 }
  0x24   :  { %790 = dma.done.wait [#allocation7], 4096  }
  0x25   :  { %791 = vsyncadd [#allocation7], 4294963200  ;;  %v110_v0 = vld [vmem:[#allocation8 + $0x78] sm:$0xff]  ;;  %v109_v1 = vld [vmem:[#allocation8 + $0x70] sm:$0xff] }
  0x26   :  { %590 = vmatprep.subr.mxu0 %v110_v0  ;;  %v108_v2 = vld [vmem:[#allocation8 + $0x68] sm:$0xff]  ;;  %v107_v3 = vld [vmem:[#allocation8 + $0x60] sm:$0xff]  ;;  %v106_v5 = vld [vmem:[#allocation8 + $0x58] sm:$0xff] }
  0x27   :  { %591 = vmatpush3.msra.mxu0 %v110_v0  ;;  %v79_v4 = vld [vmem:[#allocation6] sm:$0xff]  ;;  %v105_v6 = vld [vmem:[#allocation8 + $0x50] sm:$0xff]  ;;  %v104_v7 = vld [vmem:[#allocation8 + $0x48] sm:$0xff] }
  0x28   :  { %592 = vmatprep.subr.mxu0 %v109_v1  ;;  %622 = vmatprep.mubr.f32.mxu0 %v79_v4  ;;  %v103_v8 = vld [vmem:[#allocation8 + $0x40] sm:$0xff]  ;;  %v102_v9 = vld [vmem:[#allocation8 + $0x38] sm:$0xff]  ;;  %v101_v10 = vld [vmem:[#allocation8 + $0x30] sm:$0xff] }
  0x29   :  { %593 = vmatpush3.msra.mxu0 %v109_v1  ;;  %v100_v11 = vld [vmem:[#allocation8 + $0x28] sm:$0xff]  ;;  %v99_v12 = vld [vmem:[#allocation8 + $0x20] sm:$0xff]  ;;  %v98_v13 = vld [vmem:[#allocation8 + $0x18] sm:$0xff] }
  0x2a   :  { %594 = vmatprep.subr.mxu0 %v108_v2  ;;  %v97_v14 = vld [vmem:[#allocation8 + $0x10] sm:$0xff]  ;;  %v96_v15 = vld [vmem:[#allocation8 + $0x8] sm:$0xff]  ;;  %v95_v16 = vld [vmem:[#allocation8] sm:$0xff] }
  0x2b   :  { %595 = vmatpush3.msra.mxu0 %v108_v2  ;;  %v80_v17 = vld [vmem:[#allocation6 + $0x8] sm:$0xff]  ;;  %v81_v18 = vld [vmem:[#allocation6 + $0x10] sm:$0xff]  ;;  %v82_v19 = vld [vmem:[#allocation6 + $0x18] sm:$0xff] }
  0x2c   :  { %596 = vmatprep.subr.mxu0 %v107_v3  ;;  %v83_v20 = vld [vmem:[#allocation6 + $0x20] sm:$0xff]  ;;  %v84_v21 = vld [vmem:[#allocation6 + $0x28] sm:$0xff]  ;;  %v85_v22 = vld [vmem:[#allocation6 + $0x30] sm:$0xff] }
  0x2d   :  { %597 = vmatpush3.msra.mxu0 %v107_v3  ;;  %v86_v23 = vld [vmem:[#allocation6 + $0x38] sm:$0xff]  ;;  %v87_v24 = vld [vmem:[#allocation6 + $0x40] sm:$0xff]  ;;  %v88_v25 = vld [vmem:[#allocation6 + $0x48] sm:$0xff] }
  0x2e   :  { %598 = vmatprep.subr.mxu0 %v106_v5  ;;  %v89_v26 = vld [vmem:[#allocation6 + $0x50] sm:$0xff]  ;;  %v90_v27 = vld [vmem:[#allocation6 + $0x58] sm:$0xff]  ;;  %v91_v28 = vld [vmem:[#allocation6 + $0x60] sm:$0xff] }
  0x2f   :  { %599 = vmatpush3.msra.mxu0 %v106_v5  ;;  %v92_v29 = vld [vmem:[#allocation6 + $0x68] sm:$0xff]  ;;  %v93_v30 = vld [vmem:[#allocation6 + $0x70] sm:$0xff]  ;;  %v94_v31 = vld [vmem:[#allocation6 + $0x78] sm:$0xff] }
  0x30   :  { %600 = vmatprep.subr.mxu0 %v105_v6  ;;  %v279_v32 = vld [vmem:[#allocation3] sm:$0xff]  ;;  %v280_v2 = vld [vmem:[#allocation3 + $0x8] sm:$0xff]  ;;  %v281_v3 = vld [vmem:[#allocation3 + $0x10] sm:$0xff] }
  0x31   :  { %601 = vmatpush3.msra.mxu0 %v105_v6  ;;  %678 = vmatprep.mubr.f32.mxu1 %v279_v32  ;;  %v525_v47 = vld [vmem:[%s855_s3] ss:$0 sm:$0xff]  ;;  %v282_v4 = vld [vmem:[#allocation3 + $0x18] sm:$0xff]  ;;  %v284_v6 = vld [vmem:[#allocation3 + $0x28] sm:$0xff]  ;;  %s799_s3 = smov [#allocation9]  }
  0x32   :  { %602 = vmatprep.subr.mxu0 %v104_v7  ;;  %v283_v5 = vld [vmem:[#allocation3 + $0x20] sm:$0xff]  ;;  %s512_s5 = sshll.u32 %s799_s3, 4  ;;  %s513_s5 = int_to_ptr.vmem [resolvable:$true] %s512_s5 }
  0x33   :  { %603 = vmatpush3.msra.mxu0 %v104_v7  ;;  %v285_v7 = vld [vmem:[#allocation3 + $0x30] sm:$0xff]  ;;  %s768_s6 = scalar_lea.vmem %s513_s5, 2048  ;;  %p773_p2 = scmp.lt.s32.totalorder %s513_s5, %s513_s5 }
  0x34   :  { %604 = vmatprep.subr.mxu0 %v103_v8  ;;  %p769_p1 = scmp.ne.s32.totalorder %s513_s5, %s768_s6  ;;  %p774_p3 = scmp.lt.s32.totalorder %s768_s6, %s768_s6 }
  0x35   :  { %605 = vmatpush3.msra.mxu0 %v103_v8  ;;  %v286_v8 = vld [vmem:[#allocation3 + $0x38] sm:$0xff] }
  0x36   :  { %606 = vmatprep.subr.mxu0 %v102_v9  ;;  %p775_p4 = por %p774_p3, %p773_p2 }
  0x37   :  { %607 = vmatpush3.msra.mxu0 %v102_v9  ;;  %v287_v9 = vld [vmem:[#allocation3 + $0x40] sm:$0xff] }
  0x38   :  { %608 = vmatprep.subr.mxu0 %v101_v10  ;;  %p776_p5 = pnand %p775_p4, %p769_p1 }
  0x39   :  { %609 = vmatpush3.msra.mxu0 %v101_v10  ;;  %v288_v10 = vld [vmem:[#allocation3 + $0x48] sm:$0xff] }
  0x3a   :  { %610 = vmatprep.subr.mxu0 %v100_v11 }
  0x3b   :  { %611 = vmatpush3.msra.mxu0 %v100_v11  ;;  %v289_v11 = vld [vmem:[#allocation3 + $0x50] sm:$0xff] }
  0x3c   :  { %612 = vmatprep.subr.mxu0 %v99_v12 }
  0x3d   :  { %613 = vmatpush3.msra.mxu0 %v99_v12  ;;  %v290_v12 = vld [vmem:[#allocation3 + $0x58] sm:$0xff] }
  0x3e   :  { %614 = vmatprep.subr.mxu0 %v98_v13 }
  0x3f   :  { %615 = vmatpush3.msra.mxu0 %v98_v13  ;;  %v291_v13 = vld [vmem:[#allocation3 + $0x60] sm:$0xff] }
  0x40   :  { %616 = vmatprep.subr.mxu0 %v97_v14 }
  0x41   :  { %617 = vmatpush3.msra.mxu0 %v97_v14  ;;  %v292_v14 = vld [vmem:[#allocation3 + $0x68] sm:$0xff] }
  0x42   :  { %618 = vmatprep.subr.mxu0 %v96_v15 }
  0x43   :  { %619 = vmatpush3.msra.mxu0 %v96_v15  ;;  %v293_v15 = vld [vmem:[#allocation3 + $0x70] sm:$0xff] }
  0x44   :  { %620 = vmatprep.subr.mxu0 %v95_v16 }
  0x45   :  { %621 = vmatpush3.msra.mxu0 %v95_v16  ;;  %v294_v16 = vld [vmem:[#allocation3 + $0x78] sm:$0xff] }
  0x46   :  { %623 = vmatmul.mubr.f32.vlgmr.msra.gmra.mxu0 %v80_v17 }
  0x47   :  { %625 = vmatprep.mubr.f32.mxu0 %v81_v18 }
  0x4a   :  { %626 = vmatmul.mubr.f32.gmra.mxu0 %v82_v19 }
  0x4b   :  { %628 = vmatprep.mubr.f32.mxu0 %v83_v20 }
  0x4e   :  { %629 = vmatmul.mubr.f32.gmra.mxu0 %v84_v21 }
  0x4f   :  { %631 = vmatprep.mubr.f32.mxu0 %v85_v22 }
  0x52   :  { %632 = vmatmul.mubr.f32.gmra.mxu0 %v86_v23 }
  0x53   :  { %634 = vmatprep.mubr.f32.mxu0 %v87_v24 }
  0x56   :  { %635 = vmatmul.mubr.f32.gmra.mxu0 %v88_v25 }
  0x57   :  { %637 = vmatprep.mubr.f32.mxu0 %v89_v26 }
  0x5a   :  { %638 = vmatmul.mubr.f32.gmra.mxu0 %v90_v27 }
  0x5b   :  { %640 = vmatprep.mubr.f32.mxu0 %v91_v28 }
  0x5e   :  { %641 = vmatmul.mubr.f32.gmra.mxu0 %v92_v29 }
  0x5f   :  { %643 = vmatprep.mubr.f32.mxu0 %v93_v30 }
  0x62   :  { %644 = vmatmul.mubr.f32.gmra.mxu0 %v94_v31 }
 0x106   :  { %v624_v33 = vpop.f32.mrf.mxu0 }
 0x107   :  { %v190_v0 = vadd.f32 %v624_v33, %v525_v47 }
 0x108   :  { %v184_v34 = vpop.f32.mrf.mxu0 }
 0x109   :  { %v185_v1 = vadd.f32 %v525_v47, %v184_v34 }
 0x10a   :  { %v627_v35 = vpop.f32.mrf.mxu0 }
 0x10b   :  { %v200_v62 = vadd.f32 %v627_v35, %v525_v47 }
 0x10c   :  { %v194_v36 = vpop.f32.mrf.mxu0 }
 0x10d   :  { %v195_v63 = vadd.f32 %v525_v47, %v194_v36 }
 0x10e   :  { %v630_v37 = vpop.f32.mrf.mxu0 }
 0x10f   :  { %v210_v60 = vadd.f32 %v630_v37, %v525_v47 }
 0x110   :  { %v204_v38 = vpop.f32.mrf.mxu0 }
 0x111   :  { %v205_v61 = vadd.f32 %v525_v47, %v204_v38 }
 0x112   :  { %v633_v39 = vpop.f32.mrf.mxu0 }
 0x113   :  { %v220_v58 = vadd.f32 %v633_v39, %v525_v47 }
 0x114   :  { %v214_v40 = vpop.f32.mrf.mxu0 }
 0x115   :  { %v215_v59 = vadd.f32 %v525_v47, %v214_v40 }
 0x116   :  { %v636_v41 = vpop.f32.mrf.mxu0 }
 0x117   :  { %v230_v56 = vadd.f32 %v636_v41, %v525_v47 }
 0x118   :  { %v224_v42 = vpop.f32.mrf.mxu0 }
 0x119   :  { %v225_v57 = vadd.f32 %v525_v47, %v224_v42 }
 0x11a   :  { %v639_v43 = vpop.f32.mrf.mxu0 }
 0x11b   :  { %v240_v54 = vadd.f32 %v639_v43, %v525_v47 }
 0x11c   :  { %v234_v44 = vpop.f32.mrf.mxu0 }
 0x11d   :  { %v235_v55 = vadd.f32 %v525_v47, %v234_v44 }
 0x11e   :  { %v642_v45 = vpop.f32.mrf.mxu0 }
 0x11f   :  { %v250_v52 = vadd.f32 %v642_v45, %v525_v47 }
 0x120   :  { %v244_v46 = vpop.f32.mrf.mxu0 }
 0x121   :  { %v245_v53 = vadd.f32 %v525_v47, %v244_v46 }
 0x122   :  { %v645_v48 = vpop.f32.mrf.mxu0 }
 0x123   :  { %v260_v49 = vadd.f32 %v645_v48, %v525_v47 }
 0x124   :  { %v254_v50 = vpop.f32.mrf.mxu0 }
 0x125   :  { %v255_v51 = vadd.f32 %v525_v47, %v254_v50  ;;  %646 = vmatprep.subr.mxu1 %v260_v49 }
 0x126   :  { %647 = vmatpush3.msra.mxu1 %v260_v49 }
 0x127   :  { %648 = vmatprep.subr.mxu1 %v255_v51 }
 0x128   :  { %649 = vmatpush3.msra.mxu1 %v255_v51 }
 0x129   :  { %650 = vmatprep.subr.mxu1 %v250_v52 }
 0x12a   :  { %651 = vmatpush3.msra.mxu1 %v250_v52 }
 0x12b   :  { %652 = vmatprep.subr.mxu1 %v245_v53 }
 0x12c   :  { %653 = vmatpush3.msra.mxu1 %v245_v53 }
 0x12d   :  { %654 = vmatprep.subr.mxu1 %v240_v54 }
 0x12e   :  { %655 = vmatpush3.msra.mxu1 %v240_v54 }
 0x12f   :  { %656 = vmatprep.subr.mxu1 %v235_v55 }
 0x130   :  { %657 = vmatpush3.msra.mxu1 %v235_v55 }
 0x131   :  { %658 = vmatprep.subr.mxu1 %v230_v56 }
 0x132   :  { %659 = vmatpush3.msra.mxu1 %v230_v56 }
 0x133   :  { %660 = vmatprep.subr.mxu1 %v225_v57 }
 0x134   :  { %661 = vmatpush3.msra.mxu1 %v225_v57 }
 0x135   :  { %662 = vmatprep.subr.mxu1 %v220_v58 }
 0x136   :  { %663 = vmatpush3.msra.mxu1 %v220_v58 }
 0x137   :  { %664 = vmatprep.subr.mxu1 %v215_v59 }
 0x138   :  { %665 = vmatpush3.msra.mxu1 %v215_v59 }
 0x139   :  { %666 = vmatprep.subr.mxu1 %v210_v60 }
 0x13a   :  { %667 = vmatpush3.msra.mxu1 %v210_v60 }
 0x13b   :  { %668 = vmatprep.subr.mxu1 %v205_v61 }
 0x13c   :  { %669 = vmatpush3.msra.mxu1 %v205_v61 }
 0x13d   :  { %670 = vmatprep.subr.mxu1 %v200_v62 }
 0x13e   :  { %671 = vmatpush3.msra.mxu1 %v200_v62 }
 0x13f   :  { %672 = vmatprep.subr.mxu1 %v195_v63 }
 0x140   :  { %673 = vmatpush3.msra.mxu1 %v195_v63 }
 0x141   :  { %674 = vmatprep.subr.mxu1 %v190_v0 }
 0x142   :  { %675 = vmatpush3.msra.mxu1 %v190_v0 }
 0x143   :  { %676 = vmatprep.subr.mxu1 %v185_v1 }
 0x144   :  { %677 = vmatpush3.msra.mxu1 %v185_v1 }
 0x145   :  { %679 = vmatmul.mubr.f32.vlgmr.msra.gmra.mxu1 %v280_v2 }
 0x146   :  { %681 = vmatprep.mubr.f32.mxu1 %v281_v3 }
 0x149   :  { %682 = vmatmul.mubr.f32.gmra.mxu1 %v282_v4 }
 0x14a   :  { %684 = vmatprep.mubr.f32.mxu1 %v283_v5 }
 0x14d   :  { %685 = vmatmul.mubr.f32.gmra.mxu1 %v284_v6 }
 0x14e   :  { %687 = vmatprep.mubr.f32.mxu1 %v285_v7 }
 0x151   :  { %688 = vmatmul.mubr.f32.gmra.mxu1 %v286_v8 }
 0x152   :  { %690 = vmatprep.mubr.f32.mxu1 %v287_v9 }
 0x155   :  { %691 = vmatmul.mubr.f32.gmra.mxu1 %v288_v10 }
 0x156   :  { %693 = vmatprep.mubr.f32.mxu1 %v289_v11 }
 0x159   :  { %694 = vmatmul.mubr.f32.gmra.mxu1 %v290_v12 }
 0x15a   :  { %696 = vmatprep.mubr.f32.mxu1 %v291_v13 }
 0x15d   :  { %697 = vmatmul.mubr.f32.gmra.mxu1 %v292_v14 }
 0x15e   :  { %699 = vmatprep.mubr.f32.mxu1 %v293_v15 }
 0x161   :  { %700 = vmatmul.mubr.f32.gmra.mxu1 %v294_v16 }
 0x205   :  { %v680_v17 = vpop.f32.mrf.mxu1 }
 0x206   :  { %492 = vst [vmem:[#allocation9 + $0x8] sm:$0xff] %v680_v17 }
 0x207   :  { %v361_v18 = vpop.f32.mrf.mxu1 }
 0x208   :  { %491 = vst [vmem:[#allocation9] sm:$0xff] %v361_v18 }
 0x209   :  { %v683_v19 = vpop.f32.mrf.mxu1 }
 0x20a   :  { %494 = vst [vmem:[#allocation9 + $0x18] sm:$0xff] %v683_v19 }
 0x20b   :  { %v371_v20 = vpop.f32.mrf.mxu1 }
 0x20c   :  { %493 = vst [vmem:[#allocation9 + $0x10] sm:$0xff] %v371_v20 }
 0x20d   :  { %v686_v21 = vpop.f32.mrf.mxu1 }
 0x20e   :  { %496 = vst [vmem:[#allocation9 + $0x28] sm:$0xff] %v686_v21 }
 0x20f   :  { %v381_v22 = vpop.f32.mrf.mxu1 }
 0x210   :  { %495 = vst [vmem:[#allocation9 + $0x20] sm:$0xff] %v381_v22 }
 0x211   :  { %v689_v23 = vpop.f32.mrf.mxu1 }
 0x212   :  { %498 = vst [vmem:[#allocation9 + $0x38] sm:$0xff] %v689_v23 }
 0x213   :  { %v391_v24 = vpop.f32.mrf.mxu1 }
 0x214   :  { %497 = vst [vmem:[#allocation9 + $0x30] sm:$0xff] %v391_v24 }
 0x215   :  { %v692_v25 = vpop.f32.mrf.mxu1 }
 0x216   :  { %500 = vst [vmem:[#allocation9 + $0x48] sm:$0xff] %v692_v25 }
 0x217   :  { %v401_v26 = vpop.f32.mrf.mxu1 }
 0x218   :  { %499 = vst [vmem:[#allocation9 + $0x40] sm:$0xff] %v401_v26 }
 0x219   :  { %v695_v27 = vpop.f32.mrf.mxu1 }
 0x21a   :  { %502 = vst [vmem:[#allocation9 + $0x58] sm:$0xff] %v695_v27 }
 0x21b   :  { %v411_v28 = vpop.f32.mrf.mxu1 }
 0x21c   :  { %501 = vst [vmem:[#allocation9 + $0x50] sm:$0xff] %v411_v28 }
 0x21d   :  { %v698_v29 = vpop.f32.mrf.mxu1 }
 0x21e   :  { %504 = vst [vmem:[#allocation9 + $0x68] sm:$0xff] %v698_v29 }
 0x21f   :  { %v421_v30 = vpop.f32.mrf.mxu1 }
 0x220   :  { %503 = vst [vmem:[#allocation9 + $0x60] sm:$0xff] %v421_v30 }
 0x221   :  { %v701_v31 = vpop.f32.mrf.mxu1 }
 0x222   :  { %506 = vst [vmem:[#allocation9 + $0x78] sm:$0xff] %v701_v31 }
 0x223   :  { %v431_v32 = vpop.f32.mrf.mxu1 }
 0x224   :  { %505 = vst [vmem:[#allocation9 + $0x70] sm:$0xff] %v431_v32 }
 0x225   :  { %779 = shalt.err (!%p776_p5)
}
 0x226   :  { %518 = dma.vmem_to_hbm [thread:$0]  %s513_s5, 2048, %s856_s4, [#allocation5], %s796_s20, %s796_s20, %s797_s21  }
 0x227   :  { %792 = dma.done.wait [#allocation5], 2048  }
 0x228   :  { %793 = vsyncadd [#allocation5], 4294965248 }
 0x229   :  { %522 = vsyncpa [#allocation4], 1 }
 0x22a   :  { %523 = vsyncpa [#allocation7], 1 }
 0x22b   :  { %524 = vsyncpa [#allocation5], 1 }

</bundles_post_ra>
